<compile_context>
chip_gen: v6e
topology: v6e:2x2x1
jax: 0.10.0
libtpu: 0.0.40
codegen_flags: <defaults>
</compile_context>

<pallas_src>
import functools

import jax
import jax.numpy as jnp
from jax.experimental import pallas as pl
from jax.experimental.pallas import tpu as pltpu


def _round_up(x, m):
    return ((x + m - 1) // m) * m


def _choose_tile_b(B):
    """Pick a sublane-aligned batch tile and padded batch size.

    Tiny B -> a single 8-row tile.  Larger B -> grow the tile (better MXU-row
    utilization, fewer ~0.35us grid steps), capped at 256 rows, while keeping
    the grid length >= 2 so the "parallel" axis can shard across v7x's two
    TensorCores.
    """
    B_pad8 = _round_up(max(B, 1), 8)
    tile = min(B_pad8, 256)                      # cap per-step tile (VMEM / MXU rows)
    if B_pad8 >= 16 and B_pad8 // tile < 2:
        tile = _round_up((B_pad8 + 1) // 2, 8)   # force >= 2 grid steps (v7x megacore)
    B_pad = _round_up(B_pad8, tile)
    return tile, B_pad


def classifier_kernel(x_ref, we_ref, be_ref, wh_ref, bh_ref, out_ref):
    # x_ref: (TILE_B, K_pad) bf16 — already mean-pooled over patches in the
    # fused wrapper (exact here because the synthetic encoder is linear).
    #
    # patch embedding: bf16 MXU operands, f32 accumulation, f32 bias add.
    emb = jnp.dot(x_ref[...], we_ref[...],
                  preferred_element_type=jnp.float32) + be_ref[...]

    # --- ClassificationHead ---
    # normalize: inputs / inputs.norm(dim=-1, keepdim=True)
    # (zero-padded D columns do not change the norm; no eps, faithful to the
    #  PyTorch reference.  Padded batch rows carry emb == embed bias, so the
    #  norm there is nonzero; those rows are sliced away by the wrapper.)
    sumsq = jnp.sum(emb * emb, axis=-1, keepdims=True)
    feat = emb * jax.lax.rsqrt(sumsq)            # EUP rsqrt, f32 elementwise

    # Linear: feat @ W.T + b   (wh_ref already holds W.T, zero-padded)
    logits = jnp.dot(feat.astype(jnp.bfloat16), wh_ref[...],
                     preferred_element_type=jnp.float32) + bh_ref[...]
    out_ref[...] = logits.astype(out_ref.dtype)


def image_classifier_forward(images, params, *, patch=8):
    """images: (B, C, H, W) float32 (NCHW, as in PyTorch). Call under jax.jit."""
    B, C, H, W = images.shape
    ph = pw = patch
    P = (H // ph) * (W // pw)
    patch_dim = C * ph * pw

    D = params["embed_w"].shape[1]
    num_classes = params["head_w"].shape[0]

    tile_b, B_pad = _choose_tile_b(B)
    K_pad = _round_up(patch_dim, 256)
    D_pad = _round_up(D, 128)        # keep at 128-multiples (see header note)
    N_pad = _round_up(num_classes, 128)

    # Glue (fuses under jit): patchify NCHW -> (B, P, patch_dim), mean-pool
    # over P in f32 (linear, so it commutes with the patch-embed matmul),
    # zero-pad to MXU-friendly sizes, then cast to bf16 for transport.
    x = images.reshape(B, C, H // ph, ph, W // pw, pw)
    x = jnp.transpose(x, (0, 2, 4, 1, 3, 5)).reshape(B, P, patch_dim)
    x = jnp.mean(x.astype(jnp.float32), axis=1)                   # (B, patch_dim)
    x = jnp.pad(x, ((0, B_pad - B), (0, K_pad - patch_dim)))
    x = x.astype(jnp.bfloat16)

    # Parameters: zero-pad; matmul operands bf16, biases f32.
    we = jnp.pad(params["embed_w"],
                 ((0, K_pad - patch_dim), (0, D_pad - D))).astype(jnp.bfloat16)
    be = jnp.pad(params["embed_b"],
                 ((0, 0), (0, D_pad - D))).astype(jnp.float32)
    wh = jnp.pad(params["head_w"].T,   # (D, num_classes) -> (D_pad, N_pad)
                 ((0, D_pad - D), (0, N_pad - num_classes))).astype(jnp.bfloat16)
    bh = jnp.pad(params["head_b"][None, :],
                 ((0, 0), (0, N_pad - num_classes))).astype(jnp.float32)

    # VMEM budget from the actual footprint (x/out double-buffered, weights
    # single-buffered) with generous headroom; safe on v7x's 64 MiB.
    footprint = (2 * tile_b * K_pad * 2            # x   (bf16, 2 bufs)
                 + 2 * tile_b * N_pad * 4          # out (f32,  2 bufs)
                 + K_pad * D_pad * 2               # we  (bf16, 1 buf)
                 + D_pad * N_pad * 2               # wh  (bf16, 1 buf)
                 + (D_pad + N_pad) * 4)            # biases
    vmem_limit = max(4 * footprint, 4 * 1024 * 1024)

    grid = (B_pad // tile_b,)
    const = lambda i: (0, 0)
    out = pl.pallas_call(
        classifier_kernel,
        out_shape=jax.ShapeDtypeStruct((B_pad, N_pad), jnp.float32),
        grid_spec=pltpu.PrefetchScalarGridSpec(
            num_scalar_prefetch=0,
            grid=grid,
            in_specs=[
                pl.BlockSpec((tile_b, K_pad), lambda i: (i, 0)),
                # Grid-invariant operands: single-buffered (constant index_map).
                pl.BlockSpec((K_pad, D_pad), const, pipeline_mode=pl.Buffered(1)),
                pl.BlockSpec((1, D_pad), const, pipeline_mode=pl.Buffered(1)),
                pl.BlockSpec((D_pad, N_pad), const, pipeline_mode=pl.Buffered(1)),
                pl.BlockSpec((1, N_pad), const, pipeline_mode=pl.Buffered(1)),
            ],
            out_specs=pl.BlockSpec((tile_b, N_pad), lambda i: (i, 0)),
        ),
        compiler_params=pltpu.CompilerParams(
            dimension_semantics=("parallel",),
            vmem_limit_bytes=int(vmem_limit),
        ),
    )(x, we, be, wh, bh)

    # Strip sublane/lane padding.
    return out[:B, :num_classes]


def reference_forward(images, params, *, patch=8):
    """Pure-JAX f32 reference matching the PyTorch forward semantics."""
    B, C, H, W = images.shape
    ph = pw = patch
    P = (H // ph) * (W // pw)
    x = images.reshape(B, C, H // ph, ph, W // pw, pw)
    x = jnp.transpose(x, (0, 2, 4, 1, 3, 5)).reshape(B, P, C * ph * pw)
    emb = x @ params["embed_w"] + params["embed_b"]              # (B, P, D)
    feat = emb.mean(axis=1)                                      # encoder features
    feat = feat / jnp.linalg.norm(feat, axis=-1, keepdims=True)  # normalize=True
    return feat @ params["head_w"].T + params["head_b"]          # Linear


if __name__ == "__main__":
    # Small shapes consistent with the module's forward (RGB images, NCHW).
    B, C, H, W = 2, 3, 16, 16
    patch = 8
    D = 64            # encoder feature dim
    num_classes = 10

    key = jax.random.PRNGKey(0)
    k_img, k_we, k_be, k_wh, k_bh = jax.random.split(key, 5)

    images = jax.random.normal(k_img, (B, C, H, W), dtype=jnp.float32)

    patch_dim = C * patch * patch
    params = {
        # synthetic encoder params (stand-in for open_clip vision tower)
        "embed_w": 0.05 * jax.random.normal(k_we, (patch_dim, D), jnp.float32),
        "embed_b": 0.01 * jax.random.normal(k_be, (1, D), jnp.float32),
        # ClassificationHead params: weights shape (output_size, input_size)
        "head_w": 0.05 * jax.random.normal(k_wh, (num_classes, D), jnp.float32),
        "head_b": 0.01 * jax.random.normal(k_bh, (num_classes,), jnp.float32),
    }

    # jit the whole forward so patchify/transpose/pool/pad fuse with the
    # pallas_call instead of materializing extra HBM copies of the image.
    forward = jax.jit(
        functools.partial(image_classifier_forward, patch=patch))
    out = jax.block_until_ready(forward(images, params))

    ref = reference_forward(images, params, patch=patch)
    assert out.shape == (B, num_classes)
    # bf16 transport of pooled x + bf16 MXU operands (f32 accumulation)
    # -> loose tolerance vs the f32 reference.
    assert jnp.allclose(out, ref, atol=2e-2, rtol=2e-2), (out, ref)

    # TODO(synk): the real ImageEncoder wraps an open_clip CLIP vision
    # transformer; here it is replaced by a synthetic patch-embed + mean-pool
    # encoder (no checkpoint load possible).  The pool-before-embed
    # reassociation used here is only valid for this linear stand-in.
    print("KERNEL_OK")
</pallas_src>

<mosaic_0001>
module attributes {stable_mosaic.version = 11 : i64} {
  func.func @classifier_kernel(%arg0: i32, %arg1: memref<8x256xbf16, #tpu.memory_space<vmem>>, %arg2: memref<256x128xbf16, #tpu.memory_space<vmem>>, %arg3: memref<1x128xf32, #tpu.memory_space<vmem>>, %arg4: memref<128x128xbf16, #tpu.memory_space<vmem>>, %arg5: memref<1x128xf32, #tpu.memory_space<vmem>>, %arg6: memref<8x128xf32, #tpu.memory_space<vmem>>) attributes {dimension_semantics = [#tpu.dimension_semantics<parallel>], iteration_bounds = array<i64: 1>, scalar_prefetch = 0 : i64, scratch_operands = 0 : i64, tpu.core_type = #tpu.core_type<tc>, window_params = [{transform_indices = @transform_0, window_bounds = array<i64: 8, 256>}, {pipeline_mode = #tpu.pipeline_mode<synchronous>, transform_indices = @transform_1, window_bounds = array<i64: 256, 128>}, {pipeline_mode = #tpu.pipeline_mode<synchronous>, transform_indices = @transform_2, window_bounds = array<i64: 1, 128>}, {pipeline_mode = #tpu.pipeline_mode<synchronous>, transform_indices = @transform_3, window_bounds = array<i64: 128, 128>}, {pipeline_mode = #tpu.pipeline_mode<synchronous>, transform_indices = @transform_4, window_bounds = array<i64: 1, 128>}, {transform_indices = @transform_5, window_bounds = array<i64: 8, 128>}]} {
    %c0 = arith.constant 0 : index
    %c0_0 = arith.constant 0 : index
    %0 = vector.load %arg1[%c0, %c0_0] : memref<8x256xbf16, #tpu.memory_space<vmem>>, vector<8x256xbf16>
    %c0_1 = arith.constant 0 : index
    %c0_2 = arith.constant 0 : index
    %1 = vector.load %arg2[%c0_1, %c0_2] : memref<256x128xbf16, #tpu.memory_space<vmem>>, vector<256x128xbf16>
    %cst = arith.constant dense<0.000000e+00> : vector<8x128xf32>
    %2 = tpu.matmul %0, %1, %cst {dimension_numbers = #tpu.dot_dimension_numbers<[1], [0], [0], [1], [0, 0, 1, 1], [], []>} : vector<8x256xbf16>, vector<256x128xbf16>, vector<8x128xf32> -> vector<8x128xf32>
    %c0_3 = arith.constant 0 : index
    %c0_4 = arith.constant 0 : index
    %3 = vector.load %arg3[%c0_3, %c0_4] : memref<1x128xf32, #tpu.memory_space<vmem>>, vector<1x128xf32>
    %4 = vector.broadcast %3 : vector<1x128xf32> to vector<8x128xf32>
    %5 = arith.addf %2, %4 : vector<8x128xf32>
    %6 = arith.mulf %5, %5 : vector<8x128xf32>
    %cst_5 = arith.constant dense<0.000000e+00> : vector<8xf32>
    %7 = vector.multi_reduction <add>, %6, %cst_5 [1] : vector<8x128xf32> to vector<8xf32>
    %8 = vector.shape_cast %7 : vector<8xf32> to vector<8x1xf32>
    %9 = math.rsqrt %8 : vector<8x1xf32>
    %10 = vector.broadcast %9 : vector<8x1xf32> to vector<8x128xf32>
    %11 = arith.mulf %5, %10 : vector<8x128xf32>
    %12 = arith.truncf %11 : vector<8x128xf32> to vector<8x128xbf16>
    %c0_6 = arith.constant 0 : index
    %c0_7 = arith.constant 0 : index
    %13 = vector.load %arg4[%c0_6, %c0_7] : memref<128x128xbf16, #tpu.memory_space<vmem>>, vector<128x128xbf16>
    %cst_8 = arith.constant dense<0.000000e+00> : vector<8x128xf32>
    %14 = tpu.matmul %12, %13, %cst_8 {dimension_numbers = #tpu.dot_dimension_numbers<[1], [0], [0], [1], [0, 0, 1, 1], [], []>} : vector<8x128xbf16>, vector<128x128xbf16>, vector<8x128xf32> -> vector<8x128xf32>
    %c0_9 = arith.constant 0 : index
    %c0_10 = arith.constant 0 : index
    %15 = vector.load %arg5[%c0_9, %c0_10] : memref<1x128xf32, #tpu.memory_space<vmem>>, vector<1x128xf32>
    %16 = vector.broadcast %15 : vector<1x128xf32> to vector<8x128xf32>
    %17 = arith.addf %14, %16 : vector<8x128xf32>
    %c0_11 = arith.constant 0 : index
    %c0_12 = arith.constant 0 : index
    %18 = vector.load %arg6[%c0_11, %c0_12] : memref<8x128xf32, #tpu.memory_space<vmem>>, vector<8x128xf32>
    tpu.vector_store %arg6[%c0_11, %c0_12], %17 {strides = array<i32>} : memref<8x128xf32, #tpu.memory_space<vmem>>, vector<8x128xf32>,
    return
  }
  func.func @transform_0(%arg0: i32) -> (i32, i32) {
    %c0_i32 = arith.constant 0 : i32
    %c0_i32_0 = arith.constant 0 : i32
    return %arg0, %c0_i32 : i32, i32
  }
  func.func @transform_1(%arg0: i32) -> (i32, i32) {
    %c0_i32 = arith.constant 0 : i32
    %c0_i32_0 = arith.constant 0 : i32
    %c0_i32_1 = arith.constant 0 : i32
    return %c0_i32, %c0_i32_0 : i32, i32
  }
  func.func @transform_2(%arg0: i32) -> (i32, i32) {
    %c0_i32 = arith.constant 0 : i32
    %c0_i32_0 = arith.constant 0 : i32
    %c0_i32_1 = arith.constant 0 : i32
    return %c0_i32, %c0_i32_0 : i32, i32
  }
  func.func @transform_3(%arg0: i32) -> (i32, i32) {
    %c0_i32 = arith.constant 0 : i32
    %c0_i32_0 = arith.constant 0 : i32
    %c0_i32_1 = arith.constant 0 : i32
    return %c0_i32, %c0_i32_0 : i32, i32
  }
  func.func @transform_4(%arg0: i32) -> (i32, i32) {
    %c0_i32 = arith.constant 0 : i32
    %c0_i32_0 = arith.constant 0 : i32
    %c0_i32_1 = arith.constant 0 : i32
    return %c0_i32, %c0_i32_0 : i32, i32
  }
  func.func @transform_5(%arg0: i32) -> (i32, i32) {
    %c0_i32 = arith.constant 0 : i32
    %c0_i32_0 = arith.constant 0 : i32
    return %arg0, %c0_i32 : i32, i32
  }
}

</mosaic_0001>

<bundles_post_ra>
// kernel: image_classifier_forward.1
= control target key start
LH: loop header
LB: loop body
LE: loop exit
PB: predicated region body
PF: predicated region fallthrough
CT: control target
= control target key end

     0   :  { %v435_v19 = vmov 0.0   ;;  %vm436_vm0 = vmmov 0   ;;  %s551_s1 = inlined_call_operand.vmem [shape: bf16[256,128], index: 1, kind: input, shape index: {}]   ;;  %s552_s0 = inlined_call_operand.vmem [shape: bf16[8,256], index: 0, kind: input, shape index: {}]   ;;  %s553_s3 = inlined_call_operand.vmem [shape: bf16[128,128], index: 3, kind: input, shape index: {}]   ;;  %s554_s2 = inlined_call_operand.vmem [shape: f32[1,128], index: 2, kind: input, shape index: {}]   ;;  %s555_s4 = inlined_call_operand.vmem [shape: f32[1,128], index: 4, kind: input, shape index: {}]   ;;  %s556_s5 = inlined_call_operand.vmem [shape: f32[8,128], index: 5, kind: output, shape index: {}]  }
   0x1   :  { %v407_v0 = vld [vmem:[%s551_s1 + $0x78] sm:$0xff]   ;;  %v409_v2 = vld [vmem:[%s551_s1 + $0x70] sm:$0xff]   ;;  %v411_v4 = vld [vmem:[%s551_s1 + $0x68] sm:$0xff]   ;;  %385 = vmatprep.subr.bf16.mxu1 %v435_v19  ;;  %401 = vmatprep.mubr.msk.bf16.mxu1 %vm436_vm0, %v435_v19 }
   0x2   :  { %v408_v1 = vld [vmem:[%s551_s1 + $0x38] sm:$0xff]   ;;  %354 = vmatprep.subr.bf16.mxu0 %v407_v0  ;;  %v410_v3 = vld [vmem:[%s551_s1 + $0x30] sm:$0xff]   ;;  %v412_v5 = vld [vmem:[%s551_s1 + $0x28] sm:$0xff]  }
   0x3   :  { %355 = vmatpush3.bf16.msra.mxu0 %v408_v1  ;;  %v413_v6 = vld [vmem:[%s551_s1 + $0x60] sm:$0xff]   ;;  %v415_v8 = vld [vmem:[%s551_s1 + $0x58] sm:$0xff]   ;;  %v417_v10 = vld [vmem:[%s551_s1 + $0x50] sm:$0xff]  }
   0x4   :  { %356 = vmatprep.subr.bf16.mxu0 %v409_v2  ;;  %v414_v7 = vld [vmem:[%s551_s1 + $0x20] sm:$0xff]   ;;  %v416_v9 = vld [vmem:[%s551_s1 + $0x18] sm:$0xff]   ;;  %v418_v13 = vld [vmem:[%s551_s1 + $0x10] sm:$0xff]  }
   0x5   :  { %v21_v11 = vld [vmem:[%s552_s0] sm:$0xff]  ;;  %v419_v14 = vld [vmem:[%s551_s1 + $0x48] sm:$0xff]   ;;  %v425_v20 = vld [vmem:[%s553_s3 + $0x38] sm:$0xff]  }
   0x6   :  { %v328_v12 = vcombine.high %v21_v11, %v21_v11  ;;  %v420_v15 = vld [vmem:[%s551_s1 + $0x8] sm:$0xff]   ;;  %v421_v16 = vld [vmem:[%s551_s1 + $0x40] sm:$0xff]   ;;  %v327_v18 = vcombine.low %v21_v11, %v21_v11  ;;  %386 = vmatpush3.bf16.msra.mxu1 %v425_v20  ;;  %v426_v21 = vld [vmem:[%s553_s3 + $0x30] sm:$0xff]  }
   0x7   :  { %357 = vmatpush3.bf16.msra.mxu0 %v410_v3  ;;  %v422_v17 = vld [vmem:[%s551_s1] sm:$0xff]   ;;  %387 = vmatprep.subr.bf16.mxu1 %v435_v19  ;;  %v427_v22 = vld [vmem:[%s553_s3 + $0x28] sm:$0xff]   ;;  %v429_v32 = vld [vmem:[%s553_s3 + $0x18] sm:$0xff]  }
   0x8   :  { %358 = vmatprep.subr.bf16.mxu0 %v411_v4  ;;  %196 = vmatprep.mubr.bf16.mxu0 %v328_v12  ;;  %v326_v25 = vld [vmem:[%s554_s2] ss:$0 sm:$0xff]  ;;  %v430_v33 = vld [vmem:[%s553_s3 + $0x10] sm:$0xff]   ;;  %v431_v34 = vld [vmem:[%s553_s3 + $0x8] sm:$0xff]  }
   0x9   :  { %v428_v31 = vld [vmem:[%s553_s3 + $0x20] sm:$0xff]  }
   0xa   :  { %388 = vmatpush3.bf16.msra.mxu1 %v426_v21  ;;  %v432_v35 = vld [vmem:[%s553_s3] sm:$0xff]  }
   0xb   :  { %359 = vmatpush3.bf16.msra.mxu0 %v412_v5  ;;  %389 = vmatprep.subr.bf16.mxu1 %v435_v19  ;;  %v345_v40 = vld [vmem:[%s555_s4] ss:$0 sm:$0xff] }
   0xc   :  { %360 = vmatprep.subr.bf16.mxu0 %v413_v6 }
   0xe   :  { %390 = vmatpush3.bf16.msra.mxu1 %v427_v22 }
   0xf   :  { %361 = vmatpush3.bf16.msra.mxu0 %v414_v7  ;;  %391 = vmatprep.subr.bf16.mxu1 %v435_v19 }
  0x10   :  { %362 = vmatprep.subr.bf16.mxu0 %v415_v8 }
  0x12   :  { %392 = vmatpush3.bf16.msra.mxu1 %v428_v31 }
  0x13   :  { %363 = vmatpush3.bf16.msra.mxu0 %v416_v9  ;;  %393 = vmatprep.subr.bf16.mxu1 %v435_v19 }
  0x14   :  { %364 = vmatprep.subr.bf16.mxu0 %v417_v10 }
  0x16   :  { %394 = vmatpush3.bf16.msra.mxu1 %v429_v32 }
  0x17   :  { %365 = vmatpush3.bf16.msra.mxu0 %v418_v13  ;;  %395 = vmatprep.subr.bf16.mxu1 %v435_v19 }
  0x18   :  { %366 = vmatprep.subr.bf16.mxu0 %v419_v14 }
  0x1a   :  { %396 = vmatpush3.bf16.msra.mxu1 %v430_v33 }
  0x1b   :  { %367 = vmatpush3.bf16.msra.mxu0 %v420_v15  ;;  %397 = vmatprep.subr.bf16.mxu1 %v435_v19 }
  0x1c   :  { %368 = vmatprep.subr.bf16.mxu0 %v421_v16 }
  0x1e   :  { %398 = vmatpush3.bf16.msra.mxu1 %v431_v34 }
  0x1f   :  { %369 = vmatpush3.bf16.msra.mxu0 %v422_v17  ;;  %399 = vmatprep.subr.bf16.mxu1 %v435_v19 }
  0x22   :  { %197 = vmatmul.mubr.bf16.vlgmr.msra.gmra.mxu0 %v327_v18  ;;  %400 = vmatpush3.bf16.msra.mxu1 %v432_v35 }
  0xe2   :  { %v370_v23 = vpop.f32.mrf.mxu0 }
  0xe4   :  { %v371_v24 = vpop.f32.mrf.mxu0 }
  0xe5   :  { %v372_v26 = vadd.f32 %v371_v24, %v370_v23 }
  0xe6   :  { %v373_v27 = vpop.f32.mrf.mxu0 }
  0xe7   :  { %v199_v28 = vadd.f32 %v372_v26, %v326_v25 }
  0xe8   :  { %v374_v29 = vpop.f32.mrf.mxu0 }
  0xe9   :  { %v204_v30 = vmul.f32 %v199_v28, %v199_v28 }
  0xeb   :  { %205 = vadd.xlane.f32.xlu0 %v204_v30 }
 0x174   :  { %v206_v36 = vpop.xlane.xlu0 %205 }
 0x175   :  { %433 = vrsqrt.f32 %v206_v36 }
 0x182   :  { %v434_v37 = vpop.eup %433 }
 0x183   :  { %v208_v38 = vmul.f32 %v434_v37, %v199_v28 }
 0x185   :  { %v209_v39 = vpack.c.bf16 %v208_v38, %v208_v38 }
 0x187   :  { %402 = vmatmul.mubr.bf16.vlgmr.msra.gmra.mxu1 %v209_v39 }
 0x247   :  { %v315_v41 = vpop.f32.mrf.mxu1 }
 0x248   :  { %v316_v42 = vadd.f32 %v345_v40, %v315_v41 }
 0x249   :  { %v403_v43 = vpop.f32.mrf.mxu1 }
 0x24a   :  { %321 = vst [vmem:[%s556_s5] sm:$0xff] %v316_v42 }
 0x24b   :  { %v318_v44 = vpop.f32.mrf.mxu1 }
 0x24d   :  { %v404_v45 = vpop.f32.mrf.mxu1 }

</bundles_post_ra>
